<compile_context>
chip_gen: v7x
topology: tpu7x:2x2x1
jax: 0.10.0
libtpu: 0.0.40
codegen_flags: <defaults>
</compile_context>

<pallas_src>
import jax
import jax.numpy as jnp
from jax.experimental import pallas as pl
from jax.experimental.pallas import tpu as pltpu

LANE = 128
SUBLANE = 8


def _round_up(x, m):
    return (x + m - 1) // m * m


def _cdiv(a, b):
    return -(-a // b)


def mlp_kernel(x_ref, w1_ref, b1_ref, w2_ref, b2_ref, w3_ref, b3_ref, out_ref):
    # x tile: (TM, C) f32 -> cast to bf16 for the MXU; weights bf16 (resident across
    # grid steps, constant index_map); biases f32; accumulation/bias/ReLU in f32.
    x = x_ref[...].astype(jnp.bfloat16)
    h1 = jnp.dot(x, w1_ref[...], preferred_element_type=jnp.float32) + b1_ref[...]
    h1 = jnp.maximum(h1, 0.0)
    h2 = jnp.dot(h1.astype(jnp.bfloat16), w2_ref[...],
                 preferred_element_type=jnp.float32) + b2_ref[...]
    h2 = jnp.maximum(h2, 0.0)
    logits = jnp.dot(h2.astype(jnp.bfloat16), w3_ref[...],
                     preferred_element_type=jnp.float32) + b3_ref[...]
    out_ref[...] = logits.astype(out_ref.dtype)  # bf16 store (halves HBM write traffic)


def init_params(key, input_channel, hidden_channel, num_classes):
    """nn.Linear-style init (uniform +/- 1/sqrt(fan_in)); weights stored (in, out)."""
    def linear(key, fan_in, fan_out):
        kw, kb = jax.random.split(key)
        bound = 1.0 / (fan_in ** 0.5)
        w = jax.random.uniform(kw, (fan_in, fan_out), jnp.float32, -bound, bound)
        b = jax.random.uniform(kb, (1, fan_out), jnp.float32, -bound, bound)
        return w, b

    k1, k2, k3 = jax.random.split(key, 3)
    w1, b1 = linear(k1, input_channel, hidden_channel)
    w2, b2 = linear(k2, hidden_channel, hidden_channel)
    w3, b3 = linear(k3, hidden_channel, num_classes)
    return (w1, b1, w2, b2, w3, b3)


def prepare_params(params):
    """Zero-pad hidden/class dims to the 128-lane boundary; cast weights to bf16.

    Padding is numerically inert: padded bias entries are 0, ReLU(0)=0, and the
    corresponding weight rows/cols are 0, so padded lanes never contribute.
    """
    w1, b1, w2, b2, w3, b3 = params
    c_in, h = w1.shape
    nc = w3.shape[1]
    hp = _round_up(h, LANE)
    ncp = _round_up(nc, LANE)

    w1p = jnp.zeros((c_in, hp), jnp.float32).at[:, :h].set(w1).astype(jnp.bfloat16)
    b1p = jnp.zeros((1, hp), jnp.float32).at[:, :h].set(b1)
    w2p = jnp.zeros((hp, hp), jnp.float32).at[:h, :h].set(w2).astype(jnp.bfloat16)
    b2p = jnp.zeros((1, hp), jnp.float32).at[:, :h].set(b2)
    w3p = jnp.zeros((hp, ncp), jnp.float32).at[:h, :nc].set(w3).astype(jnp.bfloat16)
    b3p = jnp.zeros((1, ncp), jnp.float32).at[:, :nc].set(b3)
    return (w1p, b1p, w2p, b2p, w3p, b3p), nc


def _row_tiling(n, tm_cap):
    """Pick (tile_rows, n_padded) so padding is small and there are >=4 grid steps
    whenever the batch allows (feeds both v7x TensorCores via the parallel axis)."""
    tm_cap = max(SUBLANE, _round_up(tm_cap, SUBLANE))
    n_pad0 = _round_up(n, SUBLANE)
    steps = max(4, _cdiv(n_pad0, tm_cap))          # >=4 steps when possible
    tm_eff = min(tm_cap, max(SUBLANE, _round_up(_cdiv(n_pad0, steps), SUBLANE)))
    steps = _cdiv(n_pad0, tm_eff)
    return tm_eff, steps * tm_eff


def mlp_forward(x, padded_params, input_channel, num_classes, tm=2048):
    """Equivalent of MLP.forward. `padded_params` from prepare_params()."""
    w1, b1, w2, b2, w3, b3 = padded_params
    c = input_channel
    hp = w1.shape[1]
    ncp = w3.shape[1]

    # No wrapper-side dtype conversion: x goes in as-is (f32), cast in-kernel.
    x2d = x.reshape(-1, c)
    n = x2d.shape[0]

    tm_eff, n_pad = _row_tiling(n, tm)
    if n_pad != n:
        # Single (usually tiny: <= a few rows per step) pad pass; padded rows produce
        # relu(bias)-derived garbage that is sliced off below.
        x2d = jnp.pad(x2d, ((0, n_pad - n), (0, 0)))

    grid = (n_pad // tm_eff,)
    x_itemsize = x2d.dtype.itemsize

    # Advisory cost for the XLA scheduler (kernel is HBM-bound at these widths).
    flops = 2 * n_pad * (c * hp + hp * hp + hp * ncp)
    bytes_accessed = (
        n_pad * c * x_itemsize               # x tiles (f32 in, cast in-kernel)
        + n_pad * ncp * 2                    # output (bf16)
        + (c * hp + hp * hp + hp * ncp) * 2  # bf16 weights
        + (2 * hp + ncp) * 4                 # f32 biases
    )
    cost = pl.CostEstimate(flops=flops, transcendentals=0,
                           bytes_accessed=bytes_accessed)

    # VMEM budget sized from the actual per-step buffers, with 2x headroom.
    vmem_need = (
        2 * tm_eff * c * x_itemsize          # double-buffered x tile
        + 2 * tm_eff * ncp * 2               # double-buffered bf16 out tile
        + 2 * (c * hp + hp * hp + hp * ncp) * 2  # bf16 weights (allow 2 buffers)
        + 2 * (2 * hp + ncp) * 4             # f32 biases
        + 2 * tm_eff * hp * 4                # h1/h2 f32 temporaries
    )
    vmem_limit = int(min(max(2 * vmem_need, 8 << 20), 48 << 20))

    out = pl.pallas_call(
        mlp_kernel,
        out_shape=jax.ShapeDtypeStruct((n_pad, ncp), jnp.bfloat16),
        grid_spec=pltpu.PrefetchScalarGridSpec(
            num_scalar_prefetch=0,
            grid=grid,
            in_specs=[
                pl.BlockSpec((tm_eff, c), lambda i: (i, 0)),   # x row tile (f32)
                pl.BlockSpec((c, hp),     lambda i: (0, 0)),   # w1 (resident)
                pl.BlockSpec((1, hp),     lambda i: (0, 0)),   # b1
                pl.BlockSpec((hp, hp),    lambda i: (0, 0)),   # w2
                pl.BlockSpec((1, hp),     lambda i: (0, 0)),   # b2
                pl.BlockSpec((hp, ncp),   lambda i: (0, 0)),   # w3
                pl.BlockSpec((1, ncp),    lambda i: (0, 0)),   # b3
            ],
            out_specs=pl.BlockSpec((tm_eff, ncp), lambda i: (i, 0)),
        ),
        compiler_params=pltpu.CompilerParams(
            dimension_semantics=("parallel",),
            vmem_limit_bytes=vmem_limit,
        ),
        cost_estimate=cost,
    )(x2d, w1, b1, w2, b2, w3, b3)

    # Drop row padding and lane padding on the class dim; upcast the tiny real slice.
    return out[:n, :num_classes].astype(jnp.float32)


if __name__ == "__main__":
    input_channel = 64      # = 4 * 4 * 4 flattened
    hidden_channel = 32
    num_classes = 10

    key = jax.random.PRNGKey(0)
    kx, kp = jax.random.split(key)

    # NCHW input, flattened by forward() to (-1, input_channel)
    x = jax.random.normal(kx, (2, 4, 4, 4), dtype=jnp.float32)
    params = init_params(kp, input_channel, hidden_channel, num_classes)
    padded_params, _ = prepare_params(params)

    logits = mlp_forward(x, padded_params, input_channel, num_classes)
    jax.block_until_ready(logits)

    # Reference check in plain f32 JAX (kernel uses bf16 matmul inputs / bf16 output,
    # f32 accumulation).
    w1, b1, w2, b2, w3, b3 = params
    x2d = x.reshape(-1, input_channel)
    h1 = jnp.maximum(x2d @ w1 + b1, 0.0)
    h2 = jnp.maximum(h1 @ w2 + b2, 0.0)
    ref = h2 @ w3 + b3

    assert logits.shape == (2, num_classes), logits.shape
    assert jnp.allclose(logits, ref, atol=3e-2, rtol=3e-2), "mismatch vs reference"

    print("KERNEL_OK")
</pallas_src>

<mosaic_0001>
module attributes {stable_mosaic.version = 11 : i64} {
  func.func @mlp_kernel(%arg0: i32, %arg1: memref<8x64xf32, #tpu.memory_space<vmem>>, %arg2: memref<64x128xbf16, #tpu.memory_space<vmem>>, %arg3: memref<1x128xf32, #tpu.memory_space<vmem>>, %arg4: memref<128x128xbf16, #tpu.memory_space<vmem>>, %arg5: memref<1x128xf32, #tpu.memory_space<vmem>>, %arg6: memref<128x128xbf16, #tpu.memory_space<vmem>>, %arg7: memref<1x128xf32, #tpu.memory_space<vmem>>, %arg8: memref<8x128xbf16, #tpu.memory_space<vmem>>) attributes {dimension_semantics = [#tpu.dimension_semantics<parallel>], iteration_bounds = array<i64: 1>, scalar_prefetch = 0 : i64, scratch_operands = 0 : i64, tpu.core_type = #tpu.core_type<tc>, window_params = [{transform_indices = @transform_0, window_bounds = array<i64: 8, 64>}, {pipeline_mode = #tpu.pipeline_mode<synchronous>, transform_indices = @transform_1, window_bounds = array<i64: 64, 128>}, {pipeline_mode = #tpu.pipeline_mode<synchronous>, transform_indices = @transform_2, window_bounds = array<i64: 1, 128>}, {pipeline_mode = #tpu.pipeline_mode<synchronous>, transform_indices = @transform_3, window_bounds = array<i64: 128, 128>}, {pipeline_mode = #tpu.pipeline_mode<synchronous>, transform_indices = @transform_4, window_bounds = array<i64: 1, 128>}, {pipeline_mode = #tpu.pipeline_mode<synchronous>, transform_indices = @transform_5, window_bounds = array<i64: 128, 128>}, {pipeline_mode = #tpu.pipeline_mode<synchronous>, transform_indices = @transform_6, window_bounds = array<i64: 1, 128>}, {transform_indices = @transform_7, window_bounds = array<i64: 8, 128>}]} {
    %c0 = arith.constant 0 : index
    %c0_0 = arith.constant 0 : index
    %0 = vector.load %arg1[%c0, %c0_0] : memref<8x64xf32, #tpu.memory_space<vmem>>, vector<8x64xf32>
    %1 = arith.truncf %0 : vector<8x64xf32> to vector<8x64xbf16>
    %c0_1 = arith.constant 0 : index
    %c0_2 = arith.constant 0 : index
    %2 = vector.load %arg2[%c0_1, %c0_2] : memref<64x128xbf16, #tpu.memory_space<vmem>>, vector<64x128xbf16>
    %cst = arith.constant dense<0.000000e+00> : vector<8x128xf32>
    %3 = tpu.matmul %1, %2, %cst {dimension_numbers = #tpu.dot_dimension_numbers<[1], [0], [0], [1], [0, 0, 1, 1], [], []>} : vector<8x64xbf16>, vector<64x128xbf16>, vector<8x128xf32> -> vector<8x128xf32>
    %c0_3 = arith.constant 0 : index
    %c0_4 = arith.constant 0 : index
    %4 = vector.load %arg3[%c0_3, %c0_4] : memref<1x128xf32, #tpu.memory_space<vmem>>, vector<1x128xf32>
    %5 = vector.broadcast %4 : vector<1x128xf32> to vector<8x128xf32>
    %6 = arith.addf %3, %5 : vector<8x128xf32>
    %cst_5 = arith.constant 0.000000e+00 : f32
    %7 = vector.broadcast %cst_5 : f32 to vector<8x128xf32>
    %8 = arith.maximumf %6, %7 : vector<8x128xf32>
    %9 = arith.truncf %8 : vector<8x128xf32> to vector<8x128xbf16>
    %c0_6 = arith.constant 0 : index
    %c0_7 = arith.constant 0 : index
    %10 = vector.load %arg4[%c0_6, %c0_7] : memref<128x128xbf16, #tpu.memory_space<vmem>>, vector<128x128xbf16>
    %cst_8 = arith.constant dense<0.000000e+00> : vector<8x128xf32>
    %11 = tpu.matmul %9, %10, %cst_8 {dimension_numbers = #tpu.dot_dimension_numbers<[1], [0], [0], [1], [0, 0, 1, 1], [], []>} : vector<8x128xbf16>, vector<128x128xbf16>, vector<8x128xf32> -> vector<8x128xf32>
    %c0_9 = arith.constant 0 : index
    %c0_10 = arith.constant 0 : index
    %12 = vector.load %arg5[%c0_9, %c0_10] : memref<1x128xf32, #tpu.memory_space<vmem>>, vector<1x128xf32>
    %13 = vector.broadcast %12 : vector<1x128xf32> to vector<8x128xf32>
    %14 = arith.addf %11, %13 : vector<8x128xf32>
    %cst_11 = arith.constant 0.000000e+00 : f32
    %15 = vector.broadcast %cst_11 : f32 to vector<8x128xf32>
    %16 = arith.maximumf %14, %15 : vector<8x128xf32>
    %17 = arith.truncf %16 : vector<8x128xf32> to vector<8x128xbf16>
    %c0_12 = arith.constant 0 : index
    %c0_13 = arith.constant 0 : index
    %18 = vector.load %arg6[%c0_12, %c0_13] : memref<128x128xbf16, #tpu.memory_space<vmem>>, vector<128x128xbf16>
    %cst_14 = arith.constant dense<0.000000e+00> : vector<8x128xf32>
    %19 = tpu.matmul %17, %18, %cst_14 {dimension_numbers = #tpu.dot_dimension_numbers<[1], [0], [0], [1], [0, 0, 1, 1], [], []>} : vector<8x128xbf16>, vector<128x128xbf16>, vector<8x128xf32> -> vector<8x128xf32>
    %c0_15 = arith.constant 0 : index
    %c0_16 = arith.constant 0 : index
    %20 = vector.load %arg7[%c0_15, %c0_16] : memref<1x128xf32, #tpu.memory_space<vmem>>, vector<1x128xf32>
    %21 = vector.broadcast %20 : vector<1x128xf32> to vector<8x128xf32>
    %22 = arith.addf %19, %21 : vector<8x128xf32>
    %23 = arith.truncf %22 : vector<8x128xf32> to vector<8x128xbf16>
    %c0_17 = arith.constant 0 : index
    %c0_18 = arith.constant 0 : index
    %24 = vector.load %arg8[%c0_17, %c0_18] : memref<8x128xbf16, #tpu.memory_space<vmem>>, vector<8x128xbf16>
    tpu.vector_store %arg8[%c0_17, %c0_18], %23 {strides = array<i32>} : memref<8x128xbf16, #tpu.memory_space<vmem>>, vector<8x128xbf16>,
    return
  }
  func.func @transform_0(%arg0: i32) -> (i32, i32) {
    %c0_i32 = arith.constant 0 : i32
    %c0_i32_0 = arith.constant 0 : i32
    return %arg0, %c0_i32 : i32, i32
  }
  func.func @transform_1(%arg0: i32) -> (i32, i32) {
    %c0_i32 = arith.constant 0 : i32
    %c0_i32_0 = arith.constant 0 : i32
    %c0_i32_1 = arith.constant 0 : i32
    return %c0_i32, %c0_i32_0 : i32, i32
  }
  func.func @transform_2(%arg0: i32) -> (i32, i32) {
    %c0_i32 = arith.constant 0 : i32
    %c0_i32_0 = arith.constant 0 : i32
    %c0_i32_1 = arith.constant 0 : i32
    return %c0_i32, %c0_i32_0 : i32, i32
  }
  func.func @transform_3(%arg0: i32) -> (i32, i32) {
    %c0_i32 = arith.constant 0 : i32
    %c0_i32_0 = arith.constant 0 : i32
    %c0_i32_1 = arith.constant 0 : i32
    return %c0_i32, %c0_i32_0 : i32, i32
  }
  func.func @transform_4(%arg0: i32) -> (i32, i32) {
    %c0_i32 = arith.constant 0 : i32
    %c0_i32_0 = arith.constant 0 : i32
    %c0_i32_1 = arith.constant 0 : i32
    return %c0_i32, %c0_i32_0 : i32, i32
  }
  func.func @transform_5(%arg0: i32) -> (i32, i32) {
    %c0_i32 = arith.constant 0 : i32
    %c0_i32_0 = arith.constant 0 : i32
    %c0_i32_1 = arith.constant 0 : i32
    return %c0_i32, %c0_i32_0 : i32, i32
  }
  func.func @transform_6(%arg0: i32) -> (i32, i32) {
    %c0_i32 = arith.constant 0 : i32
    %c0_i32_0 = arith.constant 0 : i32
    %c0_i32_1 = arith.constant 0 : i32
    return %c0_i32, %c0_i32_0 : i32, i32
  }
  func.func @transform_7(%arg0: i32) -> (i32, i32) {
    %c0_i32 = arith.constant 0 : i32
    %c0_i32_0 = arith.constant 0 : i32
    return %arg0, %c0_i32 : i32, i32
  }
}

</mosaic_0001>

<bundles_post_ra>
// kernel: tpu_custom_call.1
= control target key start
LH: loop header
LB: loop body
LE: loop exit
PB: predicated region body
PF: predicated region fallthrough
CT: control target
= control target key end

     0   :  { %12 = vsyncpa [#allocation3], 0  ;;  %s810_s0 = inlined_call_operand.hbm [shape: f32[8,64], index: 0, kind: input, shape index: {}]   ;;  %s811_s1 = inlined_call_operand.hbm [shape: bf16[64,128], index: 1, kind: input, shape index: {}]   ;;  %s812_s2 = inlined_call_operand.vmem [shape: f32[1,128], index: 2, kind: input, shape index: {}]   ;;  %s813_s3 = inlined_call_operand.hbm [shape: bf16[128,128], index: 3, kind: input, shape index: {}]   ;;  %s814_s4 = inlined_call_operand.vmem [shape: f32[1,128], index: 4, kind: input, shape index: {}]   ;;  %s815_s5 = inlined_call_operand.hbm [shape: bf16[128,128], index: 5, kind: input, shape index: {}]   ;;  %s816_s6 = inlined_call_operand.vmem [shape: f32[1,128], index: 6, kind: input, shape index: {}]   ;;  %s817_s7 = inlined_call_operand.hbm [shape: bf16[8,128], index: 7, kind: output, shape index: {}]  }
   0x1   :  { %13 = vsyncpa [#allocation6], 0 }
   0x2   :  { %14 = vsyncpa [#allocation9], 0 }
   0x3   :  { %15 = vsyncpa [#allocation4], 0  ;;  %s657_s24 = smov [#allocation5]   ;;  %s539_s28 = scalar_lea.hbm %s811_s1, 512 }
   0x4   :  { %s31_s25 = sshll.u32 %s657_s24, 4  ;;  %p540_p0 = scmp.ne.s32.totalorder %s811_s1, %s539_s28  ;;  %s32_s25 = int_to_ptr.vmem [resolvable:$true] %s31_s25 }
   0x5   :  { %p543_p1 = scmp.lt.u32.totalorder %s539_s28, %s811_s1 }
   0x7   :  { %p545_p2 = pnand %p543_p1, %p540_p0 }
   0x9   :  { %548 = shalt.err (!%p545_p2)
}
   0xa   :  { %s549_s10 = scalar_lea.vmem %s32_s25, 512  ;;  %p554_p4 = scmp.lt.s32.totalorder %s32_s25, %s32_s25 }
   0xb   :  { %p550_p3 = scmp.ne.s32.totalorder %s32_s25, %s549_s10  ;;  %p555_p5 = scmp.lt.s32.totalorder %s549_s10, %s549_s10 }
   0xd   :  { %p556_p6 = por %p555_p5, %p554_p4 }
   0xf   :  { %p557_p7 = pnand %p556_p6, %p550_p3 }
  0x11   :  { %560 = shalt.err (!%p557_p7)
}
  0x12   :  { %s658_s11 = smov 64   ;;  %s659_s12 = smov 4  }
  0x13   :  { %37 = dma.hbm_to_vmem [thread:$0]  %s811_s1, 512, %s32_s25, [#allocation6], %s658_s11, %s658_s11, %s659_s12  }
  0x14   :  { %s660_s15 = smov [#allocation2]   ;;  %s661_s17 = smov [#allocation7]  }
  0x15   :  { %s22_s16 = sshll.u32 %s660_s15, 4  ;;  %s45_s18 = sshll.u32 %s661_s17, 4  ;;  %s23_s16 = int_to_ptr.vmem [resolvable:$true] %s22_s16  ;;  %s46_s18 = int_to_ptr.vmem [resolvable:$true] %s45_s18 }
  0x16   :  { %s561_s21 = scalar_lea.hbm %s810_s0, 128 }
  0x17   :  { %p562_p8 = scmp.ne.s32.totalorder %s810_s0, %s561_s21  ;;  %p565_p9 = scmp.lt.u32.totalorder %s561_s21, %s810_s0 }
  0x19   :  { %p567_p10 = pnand %p565_p9, %p562_p8 }
  0x1b   :  { %570 = shalt.err (!%p567_p10)
}
  0x1c   :  { %s571_s1 = scalar_lea.vmem %s23_s16, 128  ;;  %p576_p12 = scmp.lt.s32.totalorder %s23_s16, %s23_s16 }
  0x1d   :  { %p572_p11 = scmp.ne.s32.totalorder %s23_s16, %s571_s1  ;;  %p577_p13 = scmp.lt.s32.totalorder %s571_s1, %s571_s1 }
  0x1f   :  { %p578_p0 = por %p577_p13, %p576_p12 }
  0x21   :  { %p579_p1 = pnand %p578_p0, %p572_p11 }
  0x23   :  { %582 = shalt.err (!%p579_p1)
}
  0x24   :  { %25 = dma.hbm_to_vmem [thread:$0]  %s810_s0, 128, %s23_s16, [#allocation3]  }
  0x25   :  { %s583_s30 = scalar_lea.hbm %s813_s3, 1024 }
  0x26   :  { %p584_p2 = scmp.ne.s32.totalorder %s813_s3, %s583_s30  ;;  %p587_p3 = scmp.lt.u32.totalorder %s583_s30, %s813_s3 }
  0x28   :  { %p589_p4 = pnand %p587_p3, %p584_p2 }
  0x2a   :  { %592 = shalt.err (!%p589_p4)
}
  0x2b   :  { %s593_s14 = scalar_lea.vmem %s46_s18, 1024  ;;  %p598_p6 = scmp.lt.s32.totalorder %s46_s18, %s46_s18 }
  0x2c   :  { %p594_p5 = scmp.ne.s32.totalorder %s46_s18, %s593_s14  ;;  %p599_p7 = scmp.lt.s32.totalorder %s593_s14, %s593_s14 }
  0x2e   :  { %p600_p8 = por %p599_p7, %p598_p6 }
  0x30   :  { %p601_p9 = pnand %p600_p8, %p594_p5 }
  0x32   :  { %604 = shalt.err (!%p601_p9)
}
  0x33   :  { %51 = dma.hbm_to_vmem [thread:$0]  %s813_s3, 1024, %s46_s18, [#allocation6], %s658_s11, %s658_s11, %s659_s12  }
  0x34   :  { %s662_s16 = smov [#allocation8]   ;;  %s605_s21 = scalar_lea.hbm %s815_s5, 1024 }
  0x35   :  { %s59_s17 = sshll.u32 %s662_s16, 4  ;;  %p606_p10 = scmp.ne.s32.totalorder %s815_s5, %s605_s21  ;;  %s60_s17 = int_to_ptr.vmem [resolvable:$true] %s59_s17 }
  0x36   :  { %p609_p11 = scmp.lt.u32.totalorder %s605_s21, %s815_s5 }
  0x38   :  { %p611_p12 = pnand %p609_p11, %p606_p10 }
  0x3a   :  { %614 = shalt.err (!%p611_p12)
}
  0x3b   :  { %s615_s1 = scalar_lea.vmem %s60_s17, 1024  ;;  %p620_p0 = scmp.lt.s32.totalorder %s60_s17, %s60_s17 }
  0x3c   :  { %p616_p13 = scmp.ne.s32.totalorder %s60_s17, %s615_s1  ;;  %p621_p1 = scmp.lt.s32.totalorder %s615_s1, %s615_s1 }
  0x3e   :  { %p622_p2 = por %p621_p1, %p620_p0 }
  0x40   :  { %p623_p3 = pnand %p622_p2, %p616_p13 }
  0x42   :  { %626 = shalt.err (!%p623_p3)
}
  0x43   :  { %65 = dma.hbm_to_vmem [thread:$0]  %s815_s5, 1024, %s60_s17, [#allocation9], %s658_s11, %s658_s11, %s659_s12  }
  0x44   :  { %649 = dma.done.wait [#allocation3], 128  }
  0x45   :  { %650 = vsyncadd [#allocation3], 4294967168 }
  0x46   :  { %651 = dma.done.wait [#allocation6], 1536  }
  0x47   :  { %652 = vsyncadd [#allocation6], 4294965760 }
  0x48   :  { %653 = dma.done.wait [#allocation9], 1024  }
  0x49   :  { %654 = vsyncadd [#allocation9], 4294966272  ;;  %v663_v0 = vmov 0.0   ;;  %vm664_vm0 = vmmov 0   ;;  %v519_v1 = vld [vmem:[#allocation5] sm:$0xff]   ;;  %v520_v2 = vld [vmem:[#allocation5 + $0x8] sm:$0xff]  }
  0x4a   :  { %458 = vmatprep.subr.bf16.mxu0 %v663_v0  ;;  %466 = vmatprep.mubr.msk.bf16.mxu0 %vm664_vm0, %v663_v0  ;;  %v523_v3 = vld [vmem:[#allocation7] sm:$0xff]   ;;  %v521_v4 = vld [vmem:[#allocation5 + $0x10] sm:$0xff]   ;;  %v524_v5 = vld [vmem:[#allocation7 + $0x8] sm:$0xff]   ;;  %vm122_vm1 = vcmask 523264   ;;  %s665_s28 = smov [#allocation10]  }
  0x4b   :  { %470 = vmatprep.subr.bf16.mxu1 %v663_v0  ;;  %486 = vmatprep.mubr.msk.bf16.mxu1 %vm664_vm0, %v663_v0  ;;  %v522_v6 = vld [vmem:[#allocation5 + $0x18] sm:$0xff]   ;;  %v525_v8 = vld [vmem:[#allocation7 + $0x10] sm:$0xff]   ;;  %v527_v11 = vld [vmem:[#allocation7 + $0x20] sm:$0xff]   ;;  %s400_s29 = sshll.u32 %s665_s28, 4  ;;  %s401_s29 = int_to_ptr.vmem [resolvable:$true] %s400_s29 }
  0x4c   :  { %459 = vmatpush3.bf16.msra.mxu0 %v519_v1  ;;  %471 = vmatpush3.bf16.msra.mxu1 %v523_v3  ;;  %v81_v7 = vld [vmem:[#allocation2] sm:$0xff]  ;;  %v528_v12 = vld [vmem:[#allocation7 + $0x28] sm:$0xff]   ;;  %v529_v13 = vld [vmem:[#allocation7 + $0x30] sm:$0xff]   ;;  %p632_p5 = scmp.lt.s32.totalorder %s401_s29, %s401_s29 }
  0x4d   :  { %460 = vmatprep.subr.bf16.mxu0 %v663_v0  ;;  %472 = vmatprep.subr.bf16.mxu1 %v663_v0  ;;  %v82_v9 = vpack.c.bf16 %v81_v7, %v81_v7  ;;  %v526_v10 = vld [vmem:[#allocation7 + $0x18] sm:$0xff]   ;;  %v531_v15 = vld [vmem:[#allocation8] sm:$0xff]   ;;  %v532_v16 = vld [vmem:[#allocation8 + $0x8] sm:$0xff]  }
  0x4e   :  { %v530_v14 = vld [vmem:[#allocation7 + $0x38] sm:$0xff]   ;;  %v533_v17 = vld [vmem:[#allocation8 + $0x10] sm:$0xff]   ;;  %v535_v19 = vld [vmem:[#allocation8 + $0x20] sm:$0xff]  }
  0x4f   :  { %v534_v18 = vld [vmem:[#allocation8 + $0x18] sm:$0xff]   ;;  %v536_v20 = vld [vmem:[#allocation8 + $0x28] sm:$0xff]   ;;  %v537_v29 = vld [vmem:[#allocation8 + $0x30] sm:$0xff]  }
  0x50   :  { %461 = vmatpush3.bf16.msra.mxu0 %v520_v2  ;;  %473 = vmatpush3.bf16.msra.mxu1 %v524_v5  ;;  %v411_v21 = vld [vmem:[%s812_s2] ss:$0 sm:$0xff] }
  0x51   :  { %462 = vmatprep.subr.bf16.mxu0 %v663_v0  ;;  %474 = vmatprep.subr.bf16.mxu1 %v663_v0  ;;  %v538_v30 = vld [vmem:[#allocation8 + $0x38] sm:$0xff]  }
  0x52   :  { %v417_v31 = vld [vmem:[%s814_s4] ss:$0 sm:$0xff]  ;;  %s627_s4 = scalar_lea.vmem %s401_s29, 64 }
  0x53   :  { %v426_v39 = vld [vmem:[%s816_s6] ss:$0 sm:$0xff]  ;;  %p628_p4 = scmp.ne.s32.totalorder %s401_s29, %s627_s4  ;;  %p633_p6 = scmp.lt.s32.totalorder %s627_s4, %s627_s4 }
  0x54   :  { %463 = vmatpush3.bf16.msra.mxu0 %v521_v4  ;;  %475 = vmatpush3.bf16.msra.mxu1 %v525_v8 }
  0x55   :  { %464 = vmatprep.subr.bf16.mxu0 %v663_v0  ;;  %476 = vmatprep.subr.bf16.mxu1 %v663_v0  ;;  %p634_p7 = por %p633_p6, %p632_p5 }
  0x57   :  { %p635_p8 = pnand %p634_p7, %p628_p4 }
  0x58   :  { %465 = vmatpush3.bf16.msra.mxu0 %v522_v6  ;;  %477 = vmatpush3.bf16.msra.mxu1 %v526_v10 }
  0x59   :  { %490 = vmatprep.subr.bf16.mxu0 %v663_v0  ;;  %478 = vmatprep.subr.bf16.mxu1 %v663_v0 }
  0x5b   :  { %467 = vmatmul.mubr.msk.bf16.vlgmr.msra.gmra.mrb[0].mxu0 %vm122_vm1, %v82_v9 }
  0x5c   :  { %506 = vmatprep.mubr.msk.bf16.mxu0 %vm664_vm0, %v663_v0  ;;  %479 = vmatpush3.bf16.msra.mxu1 %v527_v11 }
  0x5d   :  { %480 = vmatprep.subr.bf16.mxu1 %v663_v0  ;;  %491 = vmatpush3.bf16.msra.mxu0 %v531_v15 }
  0x5e   :  { %492 = vmatprep.subr.bf16.mxu0 %v663_v0 }
  0x60   :  { %481 = vmatpush3.bf16.msra.mxu1 %v528_v12 }
  0x61   :  { %482 = vmatprep.subr.bf16.mxu1 %v663_v0  ;;  %493 = vmatpush3.bf16.msra.mxu0 %v532_v16 }
  0x62   :  { %494 = vmatprep.subr.bf16.mxu0 %v663_v0 }
  0x64   :  { %483 = vmatpush3.bf16.msra.mxu1 %v529_v13 }
  0x65   :  { %484 = vmatprep.subr.bf16.mxu1 %v663_v0  ;;  %495 = vmatpush3.bf16.msra.mxu0 %v533_v17 }
  0x66   :  { %496 = vmatprep.subr.bf16.mxu0 %v663_v0 }
  0x68   :  { %485 = vmatpush3.bf16.msra.mxu1 %v530_v14 }
  0x69   :  { %497 = vmatpush3.bf16.msra.mxu0 %v534_v18 }
  0x6a   :  { %498 = vmatprep.subr.bf16.mxu0 %v663_v0 }
  0x6d   :  { %499 = vmatpush3.bf16.msra.mxu0 %v535_v19 }
  0x6e   :  { %500 = vmatprep.subr.bf16.mxu0 %v663_v0 }
  0x71   :  { %501 = vmatpush3.bf16.msra.mxu0 %v536_v20 }
  0x72   :  { %502 = vmatprep.subr.bf16.mxu0 %v663_v0 }
  0x75   :  { %503 = vmatpush3.bf16.msra.mxu0 %v537_v29 }
  0x76   :  { %504 = vmatprep.subr.bf16.mxu0 %v663_v0 }
  0x79   :  { %505 = vmatpush3.bf16.msra.mxu0 %v538_v30 }
 0x12e   :  { %v160_v22 = vpop.f32.mrb[0].mxu0 }
 0x12f   :  { %v161_v23 = vadd.f32 %v411_v21, %v160_v22  ;;  %v468_v24 = vpop.f32.mrb[1].mxu0 }
 0x130   :  { %v163_v25 = vpop.f32.mrb[2].mxu0 }
 0x131   :  { %v166_v26 = vmax.f32 %v161_v23, 0.0  ;;  %v469_v27 = vpop.f32.mrb[3].mxu0 }
 0x133   :  { %v167_v28 = vpack.c.bf16 %v166_v26, %v166_v26 }
 0x135   :  { %487 = vmatmul.mubr.bf16.vlgmr.msra.gmra.mrb[0].mxu1 %v167_v28 }
 0x208   :  { %v273_v32 = vpop.f32.mrb[0].mxu1 }
 0x209   :  { %v274_v33 = vadd.f32 %v417_v31, %v273_v32  ;;  %v488_v34 = vpop.f32.mrb[1].mxu1 }
 0x20a   :  { %v276_v35 = vpop.f32.mrb[2].mxu1 }
 0x20b   :  { %v279_v36 = vmax.f32 %v274_v33, 0.0  ;;  %v489_v37 = vpop.f32.mrb[3].mxu1 }
 0x20d   :  { %v280_v38 = vpack.c.bf16 %v279_v36, %v279_v36 }
 0x20f   :  { %507 = vmatmul.mubr.bf16.vlgmr.msra.gmra.mrb[4].mxu0 %v280_v38 }
 0x2e2   :  { %v386_v40 = vpop.f32.mrb[4].mxu0 }
 0x2e3   :  { %v387_v41 = vadd.f32 %v426_v39, %v386_v40  ;;  %v508_v42 = vpop.f32.mrb[5].mxu0 }
 0x2e4   :  { %v389_v43 = vpop.f32.mrb[6].mxu0 }
 0x2e5   :  { %v392_v44 = vpack.c.bf16 %v387_v41, %v387_v41  ;;  %v509_v45 = vpop.f32.mrb[7].mxu0 }
 0x2e7   :  { %393 = vst [vmem:[#allocation10] sm:$0xf] %v392_v44 }
 0x2e8   :  { %638 = shalt.err (!%p635_p8)
}
 0x2e9   :  { %s639_s6 = scalar_lea.hbm %s817_s7, 64 }
 0x2ea   :  { %p640_p9 = scmp.ne.s32.totalorder %s817_s7, %s639_s6  ;;  %p643_p10 = scmp.lt.u32.totalorder %s639_s6, %s817_s7 }
 0x2ec   :  { %p645_p11 = pnand %p643_p10, %p640_p9 }
 0x2ee   :  { %648 = shalt.err (!%p645_p11)
}
 0x2ef   :  { %403 = dma.vmem_to_hbm [thread:$0]  %s401_s29, 64, %s817_s7, [#allocation4]  }
 0x2f0   :  { %655 = dma.done.wait [#allocation4], 64  }
 0x2f1   :  { %656 = vsyncadd [#allocation4], 4294967232 }
 0x2f2   :  { %407 = vsyncpa [#allocation3], 1 }
 0x2f3   :  { %408 = vsyncpa [#allocation6], 1 }
 0x2f4   :  { %409 = vsyncpa [#allocation9], 1 }
 0x2f5   :  { %410 = vsyncpa [#allocation4], 1 }

</bundles_post_ra>
